<compile_context>
chip_gen: v7x
topology: tpu7x:2x2x1
jax: 0.10.0
libtpu: 0.0.40
codegen_flags: <defaults>
</compile_context>

<pallas_src>
import functools

import jax
import jax.numpy as jnp
from jax.experimental import pallas as pl
from jax.experimental.pallas import tpu as pltpu

_SUBLANE = 8  # f32 sublane granularity


def _round_up(n, m):
    return ((n + m - 1) // m) * m


def _pack_layout(D_in, D_fc1, D_fc2, D_out):
    """Row offsets of each parameter block inside the packed (R, C) buffer.

    Every segment starts on an 8-row (sublane) boundary so the in-kernel
    static slices stay tile-aligned.  The final 8-row segment holds the three
    bias rows (b1, b2, b3) stacked on rows 0, 1, 2.
    """
    C = max(D_fc1, D_fc2, D_out)
    r_w1 = 0
    r_w2 = r_w1 + _round_up(D_in, _SUBLANE)
    r_w3 = r_w2 + _round_up(D_fc1, _SUBLANE)
    r_b = r_w3 + _round_up(D_out, _SUBLANE)
    R = r_b + _SUBLANE
    return R, C, (r_w1, r_w2, r_w3, r_b)


def _learner_fc_kernel(x_ref, p_ref, o_ref, *, dims, layout):
    """Fused masked-MLP forward (relu -> relu -> tanh) on one batch tile."""
    D_in, D_fc1, D_fc2, D_out = dims
    r_w1, r_w2, r_w3, r_b = layout

    x = x_ref[...]                                      # (tm, D_in)
    w1 = p_ref[r_w1:r_w1 + D_in, :D_fc1]                # (D_in, D_fc1)
    w2 = p_ref[r_w2:r_w2 + D_fc1, :D_fc2]               # (D_fc1, D_fc2)
    w3t = p_ref[r_w3:r_w3 + D_out, :D_fc2]              # (D_out, D_fc2)
    b_blk = p_ref[r_b:r_b + _SUBLANE, :]                # aligned 8-row bias block
    b1 = b_blk[0:1, :D_fc1]
    b2 = b_blk[1:2, :D_fc2]
    b3 = b_blk[2:3, :D_out]

    # ---- fc1 + relu: tiny-K matmul rides the otherwise idle MXU slot -------
    h1 = jnp.dot(x, w1, preferred_element_type=jnp.float32)
    h1 = jnp.maximum(h1 + b1, 0.0)

    # ---- fc2 + relu: the only layer with both dims large -> MXU ------------
    # (If D_fc1/D_fc2 ever scale to >=128, cast h1/w2 to bf16 here on v6e/v7x
    #  while keeping f32 accumulation; at 32x32 it is not MXU-bound.)
    h2 = jnp.dot(h1, w2, preferred_element_type=jnp.float32)
    h2 = jnp.maximum(h2 + b2, 0.0)

    # ---- fc3 + tanh: N = D_out (=1) matvec as broadcast-mul + lane reduce ---
    cols = []
    for j in range(D_out):
        s = jnp.sum(h2 * w3t[j:j + 1, :], axis=-1, keepdims=True)   # (tm, 1)
        cols.append(s + b3[0:1, j:j + 1])
    y = cols[0] if D_out == 1 else jnp.concatenate(cols, axis=-1)

    # Narrow (tm, D_out) store: one masked vst per row beats writing a
    # 128-lane padded block (128x DMA bytes) plus a wrapper slice pass.
    o_ref[...] = jnp.tanh(y)


@functools.partial(jax.jit, static_argnames=("dims", "block_rows"))
def learner_fc_forward(x, packed, *, dims, block_rows=4096):
    """Forward pass of LearnerFCNets.

    x:      (B, D_in) float32.
    packed: (R, C) float32 buffer from fold_masks() (mask-folded weights + biases).
    dims:   static tuple (D_in, D_fc1, D_fc2, D_out).
    Returns (B, D_out) float32.
    """
    B, D_in = x.shape
    D_fc1, D_fc2, D_out = dims[1], dims[2], dims[3]
    assert D_in == dims[0]
    R, C, layout = _pack_layout(*dims)
    assert packed.shape == (R, C), (packed.shape, (R, C))

    # --- batch tiling --------------------------------------------------------
    # Large tiles amortize the ~0.35 us/step pipeline overhead; cap tm at half
    # the padded batch so nontrivial batches always have >= 2 grid steps
    # (keeps v7x's second TensorCore busy via the "parallel" axis; harmless on
    # the single-TC v5e/v6e where the grid is a serial loop).
    B_pad0 = _round_up(B, _SUBLANE)
    if B_pad0 <= 2 * _SUBLANE:
        tm = B_pad0
    else:
        half = _round_up((B_pad0 + 1) // 2, _SUBLANE)
        tm = min(block_rows, half)
    B_pad = _round_up(B_pad0, tm)
    grid_b = B_pad // tm
    x_p = jnp.pad(x, ((0, B_pad - B), (0, 0))) if B_pad != B else x

    flops = 2 * B_pad * (D_in * D_fc1 + D_fc1 * D_fc2 + D_fc2 * D_out)
    bytes_accessed = 4 * (B_pad * D_in + B_pad * D_out + R * C)
    cost = pl.CostEstimate(flops=flops,
                           transcendentals=B_pad * D_out,
                           bytes_accessed=bytes_accessed)

    kernel = functools.partial(_learner_fc_kernel, dims=dims, layout=layout)

    out = pl.pallas_call(
        kernel,
        out_shape=jax.ShapeDtypeStruct((B_pad, D_out), jnp.float32),
        grid=(grid_b,),
        in_specs=[
            pl.BlockSpec((tm, D_in), lambda i: (i, 0)),   # x: batch-tiled
            pl.BlockSpec((R, C), lambda i: (0, 0)),       # packed params: VMEM-resident
        ],
        out_specs=pl.BlockSpec((tm, D_out), lambda i: (i, 0)),
        compiler_params=pltpu.CompilerParams(
            dimension_semantics=("parallel",)),           # 2-TC sharding on v7x
        cost_estimate=cost,
    )(x_p, packed)

    return out if B_pad == B else out[:B]


def init_params(key, D_in, D_fc1, D_fc2, D_out, mask_prob=0.8):
    """nn.Linear-style U(-1/sqrt(fan_in), 1/sqrt(fan_in)) init, plus Bernoulli
    masks to exercise MaskedLinear.set_mask semantics (masks of ones reproduce
    the default unmasked behaviour)."""
    ks = jax.random.split(key, 9)

    def linear(kw, kb, fan_in, fan_out):
        bound = 1.0 / jnp.sqrt(float(fan_in))
        w = jax.random.uniform(kw, (fan_in, fan_out), jnp.float32, -bound, bound)
        b = jax.random.uniform(kb, (1, fan_out), jnp.float32, -bound, bound)
        return w, b

    w1, b1 = linear(ks[0], ks[1], D_in, D_fc1)
    w2, b2 = linear(ks[2], ks[3], D_fc1, D_fc2)
    w3, b3 = linear(ks[4], ks[5], D_fc2, D_out)
    m1 = jax.random.bernoulli(ks[6], mask_prob, w1.shape).astype(jnp.float32)
    m2 = jax.random.bernoulli(ks[7], mask_prob, w2.shape).astype(jnp.float32)
    m3 = jax.random.bernoulli(ks[8], mask_prob, w3.shape).astype(jnp.float32)
    return {"w1": w1, "b1": b1, "m1": m1,
            "w2": w2, "b2": b2, "m2": m2,
            "w3": w3, "b3": b3, "m3": m3}


def fold_masks(raw):
    """Fold masks into weights once (MaskedLinear's weight * mask) and pack
    all weights/biases into a single sublane-aligned f32 buffer so the kernel
    takes 2 operands (x + params) instead of 7."""
    w1 = raw["w1"] * raw["m1"]
    w2 = raw["w2"] * raw["m2"]
    w3 = raw["w3"] * raw["m3"]
    D_in, D_fc1 = w1.shape
    D_fc2 = w2.shape[1]
    D_out = w3.shape[1]
    R, C, (r_w1, r_w2, r_w3, r_b) = _pack_layout(D_in, D_fc1, D_fc2, D_out)

    p = jnp.zeros((R, C), jnp.float32)
    p = p.at[r_w1:r_w1 + D_in, :D_fc1].set(w1)
    p = p.at[r_w2:r_w2 + D_fc1, :D_fc2].set(w2)
    p = p.at[r_w3:r_w3 + D_out, :D_fc2].set(w3.T)       # fc3 weight, transposed
    p = p.at[r_b, :D_fc1].set(raw["b1"][0])
    p = p.at[r_b + 1, :D_fc2].set(raw["b2"][0])
    p = p.at[r_b + 2, :D_out].set(raw["b3"][0])
    dims = (int(D_in), int(D_fc1), int(D_fc2), int(D_out))
    return p, dims


def reference_forward(x, raw):
    """Pure-JAX reference (masks applied explicitly, like the PyTorch module)."""
    h1 = jnp.maximum(x @ (raw["w1"] * raw["m1"]) + raw["b1"], 0.0)
    h2 = jnp.maximum(h1 @ (raw["w2"] * raw["m2"]) + raw["b2"], 0.0)
    return jnp.tanh(h2 @ (raw["w3"] * raw["m3"]) + raw["b3"])


if __name__ == "__main__":
    # "2 input action/sensor ... 1 output action/sensor"; small hidden layers.
    B, D_in, D_fc1, D_fc2, D_out = 8, 2, 32, 32, 1

    key = jax.random.PRNGKey(0)
    kx, kp, kx2 = jax.random.split(key, 3)
    x = jax.random.uniform(kx, (B, D_in), jnp.float32, -1.0, 1.0)
    raw = init_params(kp, D_in, D_fc1, D_fc2, D_out)
    packed, dims = fold_masks(raw)     # done once per parameter/mask update

    out = jax.block_until_ready(learner_fc_forward(x, packed, dims=dims))
    ref = reference_forward(x, raw)
    assert out.shape == (B, D_out), out.shape
    assert jnp.allclose(out, ref, atol=1e-5, rtol=1e-5), "mismatch vs reference"

    # Exercise the multi-tile / padded-batch path (>= 2 grid steps).
    B2 = 100
    x2 = jax.random.uniform(kx2, (B2, D_in), jnp.float32, -1.0, 1.0)
    out2 = jax.block_until_ready(learner_fc_forward(x2, packed, dims=dims))
    ref2 = reference_forward(x2, raw)
    assert out2.shape == (B2, D_out), out2.shape
    assert jnp.allclose(out2, ref2, atol=1e-5, rtol=1e-5), "mismatch vs reference (B=100)"

    print("KERNEL_OK")
</pallas_src>

<mosaic_0001>
module attributes {stable_mosaic.version = 11 : i64} {
  func.func @_learner_fc_kernel(%arg0: i32, %arg1: memref<8x2xf32, #tpu.memory_space<vmem>>, %arg2: memref<56x32xf32, #tpu.memory_space<vmem>>, %arg3: memref<8x1xf32, #tpu.memory_space<vmem>>) attributes {dimension_semantics = [#tpu.dimension_semantics<parallel>], iteration_bounds = array<i64: 1>, scalar_prefetch = 0 : i64, scratch_operands = 0 : i64, tpu.core_type = #tpu.core_type<tc>, window_params = [{transform_indices = @transform_0, window_bounds = array<i64: 8, 2>}, {pipeline_mode = #tpu.pipeline_mode<synchronous>, transform_indices = @transform_1, window_bounds = array<i64: 56, 32>}, {transform_indices = @transform_2, window_bounds = array<i64: 8, 1>}]} {
    %c0 = arith.constant 0 : index
    %c0_0 = arith.constant 0 : index
    %0 = vector.load %arg1[%c0, %c0_0] : memref<8x2xf32, #tpu.memory_space<vmem>>, vector<8x2xf32>
    %c0_1 = arith.constant 0 : index
    %c0_2 = arith.constant 0 : index
    %1 = vector.load %arg2[%c0_1, %c0_2] : memref<56x32xf32, #tpu.memory_space<vmem>>, vector<2x32xf32>
    %c8 = arith.constant 8 : index
    %c0_3 = arith.constant 0 : index
    %2 = vector.load %arg2[%c8, %c0_3] : memref<56x32xf32, #tpu.memory_space<vmem>>, vector<32x32xf32>
    %c40 = arith.constant 40 : index
    %c0_4 = arith.constant 0 : index
    %3 = vector.load %arg2[%c40, %c0_4] : memref<56x32xf32, #tpu.memory_space<vmem>>, vector<1x32xf32>
    %c48 = arith.constant 48 : index
    %c0_5 = arith.constant 0 : index
    %4 = vector.load %arg2[%c48, %c0_5] : memref<56x32xf32, #tpu.memory_space<vmem>>, vector<8x32xf32>
    %5 = vector.extract_strided_slice %4 {offsets = [0, 0], sizes = [1, 32], strides = [1, 1]} : vector<8x32xf32> to vector<1x32xf32>
    %6 = vector.extract_strided_slice %4 {offsets = [1, 0], sizes = [1, 32], strides = [1, 1]} : vector<8x32xf32> to vector<1x32xf32>
    %7 = vector.extract_strided_slice %4 {offsets = [2, 0], sizes = [1, 1], strides = [1, 1]} : vector<8x32xf32> to vector<1x1xf32>
    %cst = arith.constant dense<0.000000e+00> : vector<8x32xf32>
    %8 = tpu.matmul %0, %1, %cst {dimension_numbers = #tpu.dot_dimension_numbers<[1], [0], [0], [1], [0, 0, 1, 1], [], []>} : vector<8x2xf32>, vector<2x32xf32>, vector<8x32xf32> -> vector<8x32xf32>
    %9 = vector.broadcast %5 : vector<1x32xf32> to vector<8x32xf32>
    %10 = arith.addf %8, %9 : vector<8x32xf32>
    %cst_6 = arith.constant 0.000000e+00 : f32
    %11 = vector.broadcast %cst_6 : f32 to vector<8x32xf32>
    %12 = arith.maximumf %10, %11 : vector<8x32xf32>
    %cst_7 = arith.constant dense<0.000000e+00> : vector<8x32xf32>
    %13 = tpu.matmul %12, %2, %cst_7 {dimension_numbers = #tpu.dot_dimension_numbers<[1], [0], [0], [1], [0, 0, 1, 1], [], []>} : vector<8x32xf32>, vector<32x32xf32>, vector<8x32xf32> -> vector<8x32xf32>
    %14 = vector.broadcast %6 : vector<1x32xf32> to vector<8x32xf32>
    %15 = arith.addf %13, %14 : vector<8x32xf32>
    %cst_8 = arith.constant 0.000000e+00 : f32
    %16 = vector.broadcast %cst_8 : f32 to vector<8x32xf32>
    %17 = arith.maximumf %15, %16 : vector<8x32xf32>
    %18 = vector.broadcast %3 : vector<1x32xf32> to vector<8x32xf32>
    %19 = arith.mulf %17, %18 : vector<8x32xf32>
    %cst_9 = arith.constant dense<0.000000e+00> : vector<8xf32>
    %20 = vector.multi_reduction <add>, %19, %cst_9 [1] : vector<8x32xf32> to vector<8xf32>
    %21 = vector.shape_cast %20 : vector<8xf32> to vector<8x1xf32>
    %22 = vector.broadcast %7 : vector<1x1xf32> to vector<8x1xf32>
    %23 = arith.addf %21, %22 : vector<8x1xf32>
    %24 = math.tanh %23 : vector<8x1xf32>
    %c0_10 = arith.constant 0 : index
    %c0_11 = arith.constant 0 : index
    %25 = vector.load %arg3[%c0_10, %c0_11] : memref<8x1xf32, #tpu.memory_space<vmem>>, vector<8x1xf32>
    tpu.vector_store %arg3[%c0_10, %c0_11], %24 {strides = array<i32>} : memref<8x1xf32, #tpu.memory_space<vmem>>, vector<8x1xf32>,
    return
  }
  func.func @transform_0(%arg0: i32) -> (i32, i32) {
    %c0_i32 = arith.constant 0 : i32
    %c0_i32_0 = arith.constant 0 : i32
    return %arg0, %c0_i32 : i32, i32
  }
  func.func @transform_1(%arg0: i32) -> (i32, i32) {
    %c0_i32 = arith.constant 0 : i32
    %c0_i32_0 = arith.constant 0 : i32
    %c0_i32_1 = arith.constant 0 : i32
    return %c0_i32, %c0_i32_0 : i32, i32
  }
  func.func @transform_2(%arg0: i32) -> (i32, i32) {
    %c0_i32 = arith.constant 0 : i32
    %c0_i32_0 = arith.constant 0 : i32
    return %arg0, %c0_i32 : i32, i32
  }
}

</mosaic_0001>

<bundles_post_ra>
// kernel: learner_fc_forward.1
= control target key start
LH: loop header
LB: loop body
LE: loop exit
PB: predicated region body
PF: predicated region fallthrough
CT: control target
= control target key end

     0   :  { %vm27_vm0 = vcmask 1041408   ;;  %vm23_vm1 = vcmask 15360   ;;  %v239_v0 = vmov 0.0   ;;  %vm240_vm2 = vmmov 0   ;;  %s284_s1 = inlined_call_operand.vmem [shape: f32[56,32], index: 1, kind: input, shape index: {}]   ;;  %s285_s0 = inlined_call_operand.vmem [shape: f32[8,2], index: 0, kind: input, shape index: {}]   ;;  %s286_s2 = inlined_call_operand.vmem [shape: f32[8,1], index: 2, kind: output, shape index: {}]  }
   0x1   :  { %212 = vmatprep.subr.mxu0 %v239_v0  ;;  %v12_v1 = vld [vmem:[%s284_s1] sm:$0x3]  ;;  %214 = vmatprep.mubr.msk.f32.mxu0 %vm240_vm2, %v239_v0  ;;  %v13_v3 = vld [vmem:[%s284_s1 + $0x8] sm:$0xff]  ;;  %v241_v4 = vmov 0.0|0.0   ;;  %v14_v5 = vld [vmem:[%s284_s1 + $0x10] sm:$0xff]  ;;  %v19_v10 = vlaneseq  ;;  %vm106_vm3 = vcmask 261120  }
   0x2   :  { %v11_v2 = vld [vmem:[%s285_s0] sm:$0xff]  ;;  %213 = vmatpush3.msk.msra.mxu0 %vm27_vm0, %v12_v1  ;;  %228 = vmatprep.subr.bf16.mxu1 %v241_v4  ;;  %v229_v6 = vpack.c.bf16 %v14_v5, %v13_v3  ;;  %v15_v7 = vld [vmem:[%s284_s1 + $0x18] sm:$0xff]  ;;  %v18_v13 = vld [vmem:[%s284_s1 + $0x30] sm:$0xff]  ;;  %vm195_vm4 = vcmask 7168  }
   0x3   :  { %215 = vmatmul.mubr.msk.f32.vlgmr.msra.gmra.mrb[0].mxu0 %vm23_vm1, %v11_v2  ;;  %225 = vmatprep.mubr.msk.f32.mxu1 %vm240_vm2, %v239_v0  ;;  %v16_v8 = vld [vmem:[%s284_s1 + $0x20] sm:$0xff]  ;;  %v20_v11 = vshrl.u32 %v19_v10, 7  ;;  %v204_v24 = vld [vmem:[%s284_s1 + $0x28] ss:$0 sm:$0xff] }
   0x4   :  { %230 = vmatpush3.bf16.msra.mxu1 %v229_v6  ;;  %v232_v9 = vpack.c.bf16 %v16_v8, %v15_v7 }
   0x5   :  { %231 = vmatprep.subr.bf16.mxu1 %v241_v4  ;;  %v21_v12 = vsub.s32 0, %v20_v11  ;;  %v104_v19 = vsub.s32 1, %v20_v11  ;;  %v191_v28 = vsub.s32 2, %v20_v11 }
   0x7   :  { %v22_v14 = vrot.slane %v18_v13, %v21_v12  ;;  %v105_v20 = vrot.slane %v18_v13, %v104_v19  ;;  %v192_v29 = vrot.slane %v18_v13, %v191_v28 }
   0x8   :  { %233 = vmatpush3.bf16.msra.mxu1 %v232_v9 }
  0xd6   :  { %v97_v15 = vpop.f32.mrb[0].mxu0 }
  0xd7   :  { %v98_v16 = vadd.f32 %v97_v15, %v22_v14  ;;  %v216_v17 = vpop.f32.mrb[1].mxu0 }
  0xd9   :  { %v101_v18 = vmax.f32 %v98_v16, 0.0 }
  0xdb   :  { %226 = vmatmul.mubr.msk.f32.vlgmr.msra.gmra.mrb[0].mxu1 %vm106_vm3, %v101_v18 }
 0x1ae   :  { %v176_v21 = vpop.f32.mrb[0].mxu1 }
 0x1af   :  { %v177_v22 = vadd.f32 %v176_v21, %v105_v20  ;;  %v227_v23 = vpop.f32.mrb[1].mxu1 }
 0x1b1   :  { %v180_v25 = vmax.f32 %v177_v22, 0.0 }
 0x1b3   :  { %v185_v26 = vmul.f32 %v204_v24, %v180_v25 }
 0x1b5   :  { %v186_v27 = vsel %vm106_vm3, %v185_v26, 0.0 }
 0x1b6   :  { %187 = vadd.xlane.f32.xlu0 %v186_v27 }
 0x243   :  { %v188_v30 = vpop.xlane.xlu0 %187 }
 0x244   :  { %v193_v31 = vadd.f32 %v192_v29, %v188_v30 }
 0x246   :  { %237 = vtanh.f32 %v193_v31 }
 0x250   :  { %v238_v32 = vpop.eup %237 }
 0x251   :  { %196 = vst.msk [vmem:[%s286_s2] sm:$0xff] %vm195_vm4, %v238_v32 }

</bundles_post_ra>
